<compile_context>
chip_gen: v7x
topology: tpu7x:2x2x1
jax: 0.10.0
libtpu: 0.0.40
codegen_flags: <defaults>
</compile_context>

<pallas_src>
import numpy as np
import jax
import jax.numpy as jnp
from jax.experimental import pallas as pl
from jax.experimental.pallas import tpu as pltpu


# --------------------------------------------------------------------------
# Compile-time constants (host-side numpy, built ONCE at init)
# --------------------------------------------------------------------------
def _pool_matrix_np(in_size: int, scale_factor: int, kernel: int) -> np.ndarray:
    """w[o, i] = (#upsampled positions in output window o mapping to input i) / k.

    Matches torch Upsample(mode='nearest', scale_factor) followed by
    AvgPool2d(kernel_size=kernel) (stride = kernel, floor mode)."""
    up = in_size * scale_factor
    out = up // kernel                       # floor mode: remainder rows/cols dropped
    u = np.arange(out * kernel)
    src = u // scale_factor                  # nearest-upsample source index
    onehot = (src[:, None] == np.arange(in_size)[None, :]).astype(np.float32)
    return onehot.reshape(out, kernel, in_size).sum(axis=1) / float(kernel)   # (out, in)


def _pool_patch_mean_matrix_np(channels: int, in_size: int, scale_factor: int,
                               kernel: int, patch_size: int) -> np.ndarray:
    """Constant map M_mean: flattened (c,h,w) image -> MEAN-over-patches patch vector.

    x.reshape(B, C*H*W) @ M_mean == mean_p patchify(avgpool(upsample(x)))[:, p, :]
    with patch-vector element order (c, r, s), shape (C*H*W, C*ps*ps)."""
    w = _pool_matrix_np(in_size, scale_factor, kernel)          # (P, H)
    P, H = w.shape
    assert P % patch_size == 0, "pooled size must be divisible by patch size"
    npd = P // patch_size
    wa = w.reshape(npd, patch_size, H)                          # wa[i, r, h]
    u = wa.sum(axis=0)                                          # u[r, h] = sum_i wa[i,r,h]
    # mean over the npd*npd patches folded in: K[h,w,r,s] = u[r,h]*u[s,w] / NP
    K = np.einsum('rh,sw->hwrs', u, u) / float(npd * npd)
    eye = np.eye(channels, dtype=np.float32)
    M = np.einsum('hwrs,cd->chwdrs', K, eye)                    # (c,h,w,c',r,s)
    return M.reshape(channels * H * H,
                     channels * patch_size * patch_size).astype(np.float32)


# --------------------------------------------------------------------------
# Fused kernel: (folded) pooling/patchify/encoders + loss, grid-less
# --------------------------------------------------------------------------
def _fused_clip_loss_kernel(x_ref, tok_ref, consts_ref, loss_ref):
    B, CHW = x_ref.shape
    S = tok_ref.shape[1]
    V = consts_ref.shape[0] - CHW - 1        # packed layout: [W_img | W_txt | b_img]

    # Static, sublane-aligned slices of the single packed constant buffer
    # (CHW and CHW+V are multiples of 8 for the shapes used here).
    w_img = consts_ref[0:CHW, :]             # (CHW, E)
    w_txt = consts_ref[CHW:CHW + V, :]       # (V, E)
    b_img = consts_ref[CHW + V:CHW + V + 1, :]   # (1, E)

    # ---- image path: one MXU matmul (everything linear folded offline) -----
    img = jnp.dot(x_ref[...], w_img, preferred_element_type=jnp.float32) + b_img
    img = img * jax.lax.rsqrt(jnp.sum(img * img, axis=-1, keepdims=True) + 1e-12)

    # ---- text path: embedding lookup + mean + proj == counts @ W_txt -------
    tok = tok_ref[...]                                           # (B, S) int32
    lane_ids = jax.lax.broadcasted_iota(jnp.int32, (B, V), 1)
    counts = (tok[:, 0:1] == lane_ids).astype(jnp.float32)
    for s in range(1, S):                                        # S small & static
        counts = counts + (tok[:, s:s + 1] == lane_ids).astype(jnp.float32)
    txt = jnp.dot(counts, w_txt, preferred_element_type=jnp.float32)   # 1/S folded in
    txt = txt * jax.lax.rsqrt(jnp.sum(txt * txt, axis=-1, keepdims=True) + 1e-12)

    # ---- loss ---------------------------------------------------------------
    # logits_per_image = logit_scale * img @ txt.T with logit_scale == 100
    # (released CLIP clamps it there), and loss = 1 - logits/100, so the two
    # factors cancel exactly: compute 1 - img @ txt.T directly.
    logits = jax.lax.dot_general(img, txt, (((1,), (1,)), ((), ())),
                                 preferred_element_type=jnp.float32)    # (B, B)
    loss_ref[...] = 1.0 - logits


def make_clip_loss_forward(params, *, channels, in_size, scale_factor,
                           pool_size, patch_size, seq_len):
    """Build device-resident folded constants once; return a jitted forward."""
    kernel = scale_factor * in_size // pool_size
    m_mean = _pool_patch_mean_matrix_np(channels, in_size, scale_factor,
                                        kernel, patch_size)     # (C*H*W, Dp)

    w_patch = np.asarray(params["w_patch"], np.float32)          # (Dp, WIDTH)
    b_patch = np.asarray(params["b_patch"], np.float32).reshape(1, -1)
    w_img_proj = np.asarray(params["w_img_proj"], np.float32)    # (WIDTH, E)
    w_txt_proj = np.asarray(params["w_txt_proj"], np.float32)    # (WIDTH, E)
    token_emb = np.asarray(params["token_emb"], np.float32)      # (V, WIDTH)

    w_img = m_mean @ w_patch @ w_img_proj                        # (C*H*W, E)
    b_img = b_patch @ w_img_proj                                 # (1, E)
    w_txt = (token_emb @ w_txt_proj) / float(seq_len)            # (V, E)

    packed = np.concatenate([w_img, w_txt, b_img], axis=0).astype(np.float32)
    consts = jnp.asarray(packed)        # single ~52 KB constant, uploaded once

    vmem = pl.BlockSpec(memory_space=pltpu.MemorySpace.VMEM)

    @jax.jit
    def forward(image, text):
        B = image.shape[0]
        x_flat = image.reshape(B, -1).astype(jnp.float32)        # (B, C*H*W), free
        return pl.pallas_call(
            _fused_clip_loss_kernel,
            out_shape=jax.ShapeDtypeStruct((B, B), jnp.float32),
            in_specs=[vmem, vmem, vmem],
            out_specs=vmem,
        )(x_flat, text.astype(jnp.int32), consts)

    return forward


# --------------------------------------------------------------------------
# Plain-JAX end-to-end reference (correctness check only)
# --------------------------------------------------------------------------
def _reference_forward(image, text, params, *, in_size, scale_factor,
                       pool_size, patch_size):
    B, C, _, _ = image.shape
    kernel = scale_factor * in_size // pool_size
    up = jnp.repeat(jnp.repeat(image, scale_factor, axis=2), scale_factor, axis=3)
    P = (in_size * scale_factor) // kernel
    pooled = up[:, :, :P * kernel, :P * kernel].reshape(
        B, C, P, kernel, P, kernel).mean(axis=(3, 5))
    npd = P // patch_size
    patches = pooled.reshape(B, C, npd, patch_size, npd, patch_size)
    patches = patches.transpose(0, 2, 4, 1, 3, 5).reshape(B, npd * npd, -1)
    x = patches.reshape(B * npd * npd, -1) @ params["w_patch"] + params["b_patch"]
    img = x.reshape(B, npd * npd, -1).mean(axis=1) @ params["w_img_proj"]
    img = img / jnp.sqrt((img ** 2).sum(-1, keepdims=True) + 1e-12)
    temb = jnp.take(params["token_emb"], text, axis=0)
    txt = temb.mean(axis=1) @ params["w_txt_proj"]
    txt = txt / jnp.sqrt((txt ** 2).sum(-1, keepdims=True) + 1e-12)
    logits = 100.0 * img @ txt.T
    return 1.0 - logits / 100.0


if __name__ == "__main__":
    # Small shapes consistent with the module: in_size=16, scale_factor=7,
    # pool_size=14  =>  avgpool kernel = 8, pooled image 14x14, 2x2 patches of 7.
    B, C, IN_SIZE, SF, POOL = 2, 3, 16, 7, 14
    PATCH, WIDTH, EMBED, VOCAB, SEQ = 7, 32, 16, 64, 8

    key = jax.random.PRNGKey(0)
    k_img, k_txt, k1, k2, k3, k4, k5 = jax.random.split(key, 7)

    image = jax.random.normal(k_img, (B, C, IN_SIZE, IN_SIZE), dtype=jnp.float32)
    text = jax.random.randint(k_txt, (B, SEQ), 0, VOCAB, dtype=jnp.int32)

    patch_dim = C * PATCH * PATCH
    params = {
        "w_patch": 0.05 * jax.random.normal(k1, (patch_dim, WIDTH), jnp.float32),
        "b_patch": 0.05 * jax.random.normal(k2, (1, WIDTH), jnp.float32),
        "w_img_proj": 0.05 * jax.random.normal(k3, (WIDTH, EMBED), jnp.float32),
        "w_txt_proj": 0.05 * jax.random.normal(k4, (WIDTH, EMBED), jnp.float32),
        "token_emb": 0.05 * jax.random.normal(k5, (VOCAB, WIDTH), jnp.float32),
    }

    fwd = make_clip_loss_forward(
        params, channels=C, in_size=IN_SIZE, scale_factor=SF,
        pool_size=POOL, patch_size=PATCH, seq_len=SEQ)

    loss = jax.block_until_ready(fwd(image, text))
    assert loss.shape == (B, B) and loss.dtype == jnp.float32

    ref = jax.block_until_ready(_reference_forward(
        image, text, params,
        in_size=IN_SIZE, scale_factor=SF, pool_size=POOL, patch_size=PATCH))
    assert jnp.allclose(loss, ref, rtol=1e-3, atol=1e-4), (loss, ref)

    print("KERNEL_OK")
</pallas_src>

<mosaic_0001>
module attributes {stable_mosaic.version = 11 : i64} {
  func.func @_fused_clip_loss_kernel(%arg0: memref<2x768xf32, #tpu.memory_space<vmem>>, %arg1: memref<2x8xi32, #tpu.memory_space<vmem>>, %arg2: memref<833x16xf32, #tpu.memory_space<vmem>>, %arg3: memref<2x2xf32, #tpu.memory_space<vmem>>) attributes {dimension_semantics = [], scalar_prefetch = 0 : i64, scratch_operands = 0 : i64, tpu.core_type = #tpu.core_type<tc>} {
    %c0 = arith.constant 0 : index
    %c0_0 = arith.constant 0 : index
    %0 = vector.load %arg2[%c0, %c0_0] : memref<833x16xf32, #tpu.memory_space<vmem>>, vector<768x16xf32>
    %c768 = arith.constant 768 : index
    %c0_1 = arith.constant 0 : index
    %1 = vector.load %arg2[%c768, %c0_1] : memref<833x16xf32, #tpu.memory_space<vmem>>, vector<64x16xf32>
    %c832 = arith.constant 832 : index
    %c0_2 = arith.constant 0 : index
    %2 = vector.load %arg2[%c832, %c0_2] : memref<833x16xf32, #tpu.memory_space<vmem>>, vector<1x16xf32>
    %c0_3 = arith.constant 0 : index
    %c0_4 = arith.constant 0 : index
    %3 = vector.load %arg0[%c0_3, %c0_4] : memref<2x768xf32, #tpu.memory_space<vmem>>, vector<2x768xf32>
    %cst = arith.constant dense<0.000000e+00> : vector<2x16xf32>
    %4 = tpu.matmul %3, %0, %cst {dimension_numbers = #tpu.dot_dimension_numbers<[1], [0], [0], [1], [0, 0, 1, 1], [], []>} : vector<2x768xf32>, vector<768x16xf32>, vector<2x16xf32> -> vector<2x16xf32>
    %5 = vector.broadcast %2 : vector<1x16xf32> to vector<2x16xf32>
    %6 = arith.addf %4, %5 : vector<2x16xf32>
    %7 = arith.mulf %6, %6 : vector<2x16xf32>
    %cst_5 = arith.constant dense<0.000000e+00> : vector<2xf32>
    %8 = vector.multi_reduction <add>, %7, %cst_5 [1] : vector<2x16xf32> to vector<2xf32>
    %9 = vector.shape_cast %8 : vector<2xf32> to vector<2x1xf32>
    %cst_6 = arith.constant 9.99999996E-13 : f32
    %10 = vector.broadcast %cst_6 : f32 to vector<2x1xf32>
    %11 = arith.addf %9, %10 : vector<2x1xf32>
    %12 = math.rsqrt %11 : vector<2x1xf32>
    %13 = vector.broadcast %12 : vector<2x1xf32> to vector<2x16xf32>
    %14 = arith.mulf %6, %13 : vector<2x16xf32>
    %c0_7 = arith.constant 0 : index
    %c0_8 = arith.constant 0 : index
    %15 = vector.load %arg1[%c0_7, %c0_8] : memref<2x8xi32, #tpu.memory_space<vmem>>, vector<2x8xi32>
    %16 = tpu.iota {dimensions = array<i32: 1>} : vector<2x64xi32>
    %17 = vector.extract_strided_slice %15 {offsets = [0, 0], sizes = [2, 1], strides = [1, 1]} : vector<2x8xi32> to vector<2x1xi32>
    %18 = vector.broadcast %17 : vector<2x1xi32> to vector<2x64xi32>
    %19 = arith.cmpi eq, %18, %16 : vector<2x64xi32>
    %20 = arith.extui %19 : vector<2x64xi1> to vector<2x64xi32>
    %21 = arith.sitofp %20 : vector<2x64xi32> to vector<2x64xf32>
    %22 = vector.extract_strided_slice %15 {offsets = [0, 1], sizes = [2, 1], strides = [1, 1]} : vector<2x8xi32> to vector<2x1xi32>
    %23 = vector.broadcast %22 : vector<2x1xi32> to vector<2x64xi32>
    %24 = arith.cmpi eq, %23, %16 : vector<2x64xi32>
    %25 = arith.extui %24 : vector<2x64xi1> to vector<2x64xi32>
    %26 = arith.sitofp %25 : vector<2x64xi32> to vector<2x64xf32>
    %27 = arith.addf %21, %26 : vector<2x64xf32>
    %28 = vector.extract_strided_slice %15 {offsets = [0, 2], sizes = [2, 1], strides = [1, 1]} : vector<2x8xi32> to vector<2x1xi32>
    %29 = vector.broadcast %28 : vector<2x1xi32> to vector<2x64xi32>
    %30 = arith.cmpi eq, %29, %16 : vector<2x64xi32>
    %31 = arith.extui %30 : vector<2x64xi1> to vector<2x64xi32>
    %32 = arith.sitofp %31 : vector<2x64xi32> to vector<2x64xf32>
    %33 = arith.addf %27, %32 : vector<2x64xf32>
    %34 = vector.extract_strided_slice %15 {offsets = [0, 3], sizes = [2, 1], strides = [1, 1]} : vector<2x8xi32> to vector<2x1xi32>
    %35 = vector.broadcast %34 : vector<2x1xi32> to vector<2x64xi32>
    %36 = arith.cmpi eq, %35, %16 : vector<2x64xi32>
    %37 = arith.extui %36 : vector<2x64xi1> to vector<2x64xi32>
    %38 = arith.sitofp %37 : vector<2x64xi32> to vector<2x64xf32>
    %39 = arith.addf %33, %38 : vector<2x64xf32>
    %40 = vector.extract_strided_slice %15 {offsets = [0, 4], sizes = [2, 1], strides = [1, 1]} : vector<2x8xi32> to vector<2x1xi32>
    %41 = vector.broadcast %40 : vector<2x1xi32> to vector<2x64xi32>
    %42 = arith.cmpi eq, %41, %16 : vector<2x64xi32>
    %43 = arith.extui %42 : vector<2x64xi1> to vector<2x64xi32>
    %44 = arith.sitofp %43 : vector<2x64xi32> to vector<2x64xf32>
    %45 = arith.addf %39, %44 : vector<2x64xf32>
    %46 = vector.extract_strided_slice %15 {offsets = [0, 5], sizes = [2, 1], strides = [1, 1]} : vector<2x8xi32> to vector<2x1xi32>
    %47 = vector.broadcast %46 : vector<2x1xi32> to vector<2x64xi32>
    %48 = arith.cmpi eq, %47, %16 : vector<2x64xi32>
    %49 = arith.extui %48 : vector<2x64xi1> to vector<2x64xi32>
    %50 = arith.sitofp %49 : vector<2x64xi32> to vector<2x64xf32>
    %51 = arith.addf %45, %50 : vector<2x64xf32>
    %52 = vector.extract_strided_slice %15 {offsets = [0, 6], sizes = [2, 1], strides = [1, 1]} : vector<2x8xi32> to vector<2x1xi32>
    %53 = vector.broadcast %52 : vector<2x1xi32> to vector<2x64xi32>
    %54 = arith.cmpi eq, %53, %16 : vector<2x64xi32>
    %55 = arith.extui %54 : vector<2x64xi1> to vector<2x64xi32>
    %56 = arith.sitofp %55 : vector<2x64xi32> to vector<2x64xf32>
    %57 = arith.addf %51, %56 : vector<2x64xf32>
    %58 = vector.extract_strided_slice %15 {offsets = [0, 7], sizes = [2, 1], strides = [1, 1]} : vector<2x8xi32> to vector<2x1xi32>
    %59 = vector.broadcast %58 : vector<2x1xi32> to vector<2x64xi32>
    %60 = arith.cmpi eq, %59, %16 : vector<2x64xi32>
    %61 = arith.extui %60 : vector<2x64xi1> to vector<2x64xi32>
    %62 = arith.sitofp %61 : vector<2x64xi32> to vector<2x64xf32>
    %63 = arith.addf %57, %62 : vector<2x64xf32>
    %cst_9 = arith.constant dense<0.000000e+00> : vector<2x16xf32>
    %64 = tpu.matmul %63, %1, %cst_9 {dimension_numbers = #tpu.dot_dimension_numbers<[1], [0], [0], [1], [0, 0, 1, 1], [], []>} : vector<2x64xf32>, vector<64x16xf32>, vector<2x16xf32> -> vector<2x16xf32>
    %65 = arith.mulf %64, %64 : vector<2x16xf32>
    %cst_10 = arith.constant dense<0.000000e+00> : vector<2xf32>
    %66 = vector.multi_reduction <add>, %65, %cst_10 [1] : vector<2x16xf32> to vector<2xf32>
    %67 = vector.shape_cast %66 : vector<2xf32> to vector<2x1xf32>
    %cst_11 = arith.constant 9.99999996E-13 : f32
    %68 = vector.broadcast %cst_11 : f32 to vector<2x1xf32>
    %69 = arith.addf %67, %68 : vector<2x1xf32>
    %70 = math.rsqrt %69 : vector<2x1xf32>
    %71 = vector.broadcast %70 : vector<2x1xf32> to vector<2x16xf32>
    %72 = arith.mulf %64, %71 : vector<2x16xf32>
    %cst_12 = arith.constant dense<0.000000e+00> : vector<2x2xf32>
    %73 = tpu.matmul %14, %72, %cst_12 {dimension_numbers = #tpu.dot_dimension_numbers<[1], [1], [0], [0], [0, 0, 1, 0], [], []>} : vector<2x16xf32>, vector<2x16xf32>, vector<2x2xf32> -> vector<2x2xf32>
    %cst_13 = arith.constant 1.000000e+00 : f32
    %74 = vector.broadcast %cst_13 : f32 to vector<2x2xf32>
    %75 = arith.subf %74, %73 : vector<2x2xf32>
    %c0_14 = arith.constant 0 : index
    %c0_15 = arith.constant 0 : index
    %76 = vector.load %arg3[%c0_14, %c0_15] : memref<2x2xf32, #tpu.memory_space<vmem>>, vector<2x2xf32>
    tpu.vector_store %arg3[%c0_14, %c0_15], %75 {strides = array<i32>} : memref<2x2xf32, #tpu.memory_space<vmem>>, vector<2x2xf32>,
    return
  }
}

</mosaic_0001>

<bundles_post_ra>
// kernel: forward.1
= control target key start
LH: loop header
LB: loop body
LE: loop exit
PB: predicated region body
PF: predicated region fallthrough
CT: control target
= control target key end

     0   :  { %8 = vsyncpa [#allocation3], 0  ;;  %s1073_s0 = inlined_call_operand.vmem [shape: f32[2,768], index: 0, kind: input, shape index: {}]   ;;  %s1074_s1 = inlined_call_operand.vmem [shape: s32[2,8], index: 1, kind: input, shape index: {}]   ;;  %s1075_s2 = inlined_call_operand.hbm [shape: f32[833,16], index: 2, kind: input, shape index: {}]   ;;  %s1076_s3 = inlined_call_operand.hbm [shape: f32[2,2], index: 3, kind: output, shape index: {}]  }
   0x1   :  { %9 = vsyncpa [#allocation4], 0  ;;  %s964_s12 = smov [#allocation2]   ;;  %s916_s16 = scalar_lea.hbm %s1075_s2, 13440 }
   0x2   :  { %s19_s13 = sshll.u32 %s964_s12, 4  ;;  %p917_p0 = scmp.ne.s32.totalorder %s1075_s2, %s916_s16  ;;  %s20_s13 = int_to_ptr.vmem [resolvable:$true] %s19_s13 }
   0x3   :  { %p920_p1 = scmp.lt.u32.totalorder %s916_s16, %s1075_s2 }
   0x5   :  { %p922_p2 = pnand %p920_p1, %p917_p0 }
   0x7   :  { %925 = shalt.err (!%p922_p2)
}
   0x8   :  { %s926_s21 = scalar_lea.vmem %s20_s13, 13440  ;;  %p931_p4 = scmp.lt.s32.totalorder %s20_s13, %s20_s13 }
   0x9   :  { %p927_p3 = scmp.ne.s32.totalorder %s20_s13, %s926_s21  ;;  %p932_p5 = scmp.lt.s32.totalorder %s926_s21, %s926_s21 }
   0xb   :  { %p933_p6 = por %p932_p5, %p931_p4 }
   0xd   :  { %p934_p7 = pnand %p933_p6, %p927_p3 }
   0xf   :  { %937 = shalt.err (!%p934_p7)
}
  0x10   :  { %s965_s22 = smov 128   ;;  %s966_s23 = smov 8  }
  0x11   :  { %25 = dma.hbm_to_vmem [thread:$0]  %s1075_s2, 13440, %s20_s13, [#allocation3], %s965_s22, %s965_s22, %s966_s23  }
  0x12   :  { %960 = dma.done.wait [#allocation3], 13440  }
  0x13   :  { %961 = vsyncadd [#allocation3], 4294953856  ;;  %v967_v0 = vmov 2   ;;  %v968_v1 = vmov 0   ;;  %v1015_v2 = vld [vmem:[%s1074_s1] sm:$0x3]  ;;  %v146_v11 = vlaneseq }
  0x14   :  { %904 = vset.pattern.permute.xlu1 %v967_v0  ;;  %902 = vset.pattern.permute.xlu0 %v968_v1  ;;  %v45_v3 = vld [vmem:[#allocation2 + $0x80] sm:$0xff]  ;;  %v46_v4 = vld [vmem:[#allocation2 + $0x88] sm:$0xff]  ;;  %v47_v8 = vld [vmem:[#allocation2 + $0x90] sm:$0xff]  ;;  %v969_v9 = vmov 1983009808   ;;  %v970_v20 = vmov 3  }
  0x15   :  { %408 = vperm.xlu1 %904, %v1015_v2   ;;  %395 = vperm.xlu0 %902, %v1015_v2   ;;  %v778_v5 = vpack.c.bf16 %v46_v4, %v45_v3  ;;  %v29_v6 = vld [vmem:[#allocation2] sm:$0xff]  ;;  %v30_v7 = vld [vmem:[#allocation2 + $0x8] sm:$0xff]  ;;  %v144_v10 = vunpack.c.l.s4 %v969_v9  ;;  %v48_v13 = vld [vmem:[#allocation2 + $0x98] sm:$0xff]  ;;  %v971_v21 = vmov 1   ;;  %v147_v26 = vshrl.u32 %v146_v11, 7 }
  0x16   :  { %v780_v12 = vpack.c.bf16 %v30_v7, %v29_v6  ;;  %v31_v14 = vld [vmem:[#allocation2 + $0x10] sm:$0xff]  ;;  %v32_v15 = vld [vmem:[#allocation2 + $0x18] sm:$0xff]  ;;  %v782_v16 = vpack.c.bf16 %v48_v13, %v47_v8  ;;  %v49_v17 = vld [vmem:[#allocation2 + $0xa0] sm:$0xff]  ;;  %v972_v34 = vmov 4   ;;  %v973_v35 = vmov 5  }
  0x17   :  { %779 = vmatprep.subr.bf16.mxu0 %v778_v5  ;;  %v50_v18 = vld [vmem:[#allocation2 + $0xa8] sm:$0xff]  ;;  %v784_v19 = vpack.c.bf16 %v32_v15, %v31_v14  ;;  %v33_v23 = vld [vmem:[#allocation2 + $0x20] sm:$0xff]  ;;  %v145_v25 = vunpack.c.0.s8 %v144_v10  ;;  %v51_v27 = vld [vmem:[#allocation2 + $0xb0] sm:$0xff]  ;;  %v974_v56 = vmov 6   ;;  %vm977_vm0 = vmmov 0  }
  0x18   :  { %781 = vmatpush3.bf16.msra.mxu0 %v780_v12  ;;  %v786_v22 = vpack.c.bf16 %v50_v18, %v49_v17  ;;  %v34_v24 = vld [vmem:[#allocation2 + $0x28] sm:$0xff]  ;;  %v52_v28 = vld [vmem:[#allocation2 + $0xb8] sm:$0xff]  ;;  %v35_v31 = vld [vmem:[#allocation2 + $0x30] sm:$0xff]  ;;  %v975_v12 = vmov 7   ;;  %vm449_vm9 = vcmask 523264   ;;  %vm384_vm10 = vcmask 123904  }
  0x19   :  { %905 = vset.pattern.permute.xlu1 %v970_v20  ;;  %903 = vset.pattern.permute.xlu0 %v971_v21  ;;  %v788_v29 = vpack.c.bf16 %v34_v24, %v33_v23  ;;  %v790_v30 = vpack.c.bf16 %v52_v28, %v51_v27  ;;  %v36_v32 = vld [vmem:[#allocation2 + $0x38] sm:$0xff]  ;;  %v148_v33 = vsub.s32 %v145_v25, %v147_v26  ;;  %v53_v36 = vld [vmem:[#allocation2 + $0xc0] sm:$0xff]  ;;  %v54_v37 = vld [vmem:[#allocation2 + $0xc8] sm:$0xff]  ;;  %vm530_vm11 = vcmask 130048  }
  0x1a   :  { %415 = vperm.xlu1 %905, %v1015_v2   ;;  %401 = vperm.xlu0 %903, %v1015_v2   ;;  %v77_v38 = vld [vmem:[#allocation2 + $0x180] sm:$0xff]  ;;  %v78_v39 = vld [vmem:[#allocation2 + $0x188] sm:$0xff]  ;;  %v792_v41 = vpack.c.bf16 %v36_v32, %v35_v31  ;;  %v794_v46 = vpack.c.bf16 %v54_v37, %v53_v36  ;;  %v55_v48 = vld [vmem:[#allocation2 + $0xd0] sm:$0xff]  ;;  %vm608_vm12 = vcmask 9216  }
  0x1b   :  { %783 = vmatprep.subr.bf16.mxu0 %v782_v16  ;;  %v61_v40 = vld [vmem:[#allocation2 + $0x100] sm:$0xff]  ;;  %v810_v43 = vpack.c.bf16 %v78_v39, %v77_v38  ;;  %v62_v44 = vld [vmem:[#allocation2 + $0x108] sm:$0xff]  ;;  %v56_v49 = vld [vmem:[#allocation2 + $0xd8] sm:$0xff] }
  0x1c   :  { %785 = vmatpush3.bf16.msra.mxu0 %v784_v19  ;;  %v37_v42 = vld [vmem:[#allocation2 + $0x40] sm:$0xff]  ;;  %v38_v47 = vld [vmem:[#allocation2 + $0x48] sm:$0xff]  ;;  %v812_v50 = vpack.c.bf16 %v62_v44, %v61_v40  ;;  %v79_v53 = vld [vmem:[#allocation2 + $0x190] sm:$0xff]  ;;  %v798_v3 = vpack.c.bf16 %v56_v49, %v55_v48 }
  0x1d   :  { %787 = vmatprep.subr.bf16.mxu0 %v786_v22  ;;  %v134_v45 = vld [vmem:[%s1073_s0] sm:$0xff]  ;;  %811 = vmatprep.subr.bf16.mxu1 %v810_v43  ;;  %v80_v54 = vld [vmem:[#allocation2 + $0x198] sm:$0xff]  ;;  %v63_v55 = vld [vmem:[#allocation2 + $0x110] sm:$0xff]  ;;  %v796_v61 = vpack.c.bf16 %v38_v47, %v37_v42 }
  0x1e   :  { %906 = vset.pattern.permute.xlu1 %v972_v34  ;;  %907 = vset.pattern.permute.xlu0 %v973_v35  ;;  %v1027_v51 = vrot.slane %v134_v45, %v148_v33  ;;  %v142_v52 = vcombine.high %v134_v45, %v134_v45  ;;  %v814_v58 = vpack.c.bf16 %v80_v54, %v79_v53  ;;  %v64_v59 = vld [vmem:[#allocation2 + $0x118] sm:$0xff]  ;;  %v39_v62 = vld [vmem:[#allocation2 + $0x50] sm:$0xff]  ;;  %v81_v1 = vld [vmem:[#allocation2 + $0x1a0] sm:$0xff] }
  0x1f   :  { %422 = vperm.xlu1 %906, %v1015_v2   ;;  %429 = vperm.xlu0 %907, %v1015_v2   ;;  %v40_v63 = vld [vmem:[#allocation2 + $0x58] sm:$0xff]  ;;  %v816_v0 = vpack.c.bf16 %v64_v59, %v63_v55  ;;  %v82_v4 = vld [vmem:[#allocation2 + $0x1a8] sm:$0xff]  ;;  %v65_v5 = vld [vmem:[#allocation2 + $0x120] sm:$0xff] }
  0x20   :  { %789 = vmatpush3.bf16.msra.mxu0 %v788_v29  ;;  %813 = vmatpush3.bf16.msra.mxu1 %v812_v50  ;;  %v157_v57 = vcombine.high %v1027_v51, %v1027_v51  ;;  %v1031_v60 = vrot.slane %v142_v52, %v148_v33  ;;  %v66_v6 = vld [vmem:[#allocation2 + $0x128] sm:$0xff]  ;;  %v57_v8 = vld [vmem:[#allocation2 + $0xe0] sm:$0xff]  ;;  %v818_v10 = vpack.c.bf16 %v82_v4, %v81_v1  ;;  %v83_v14 = vld [vmem:[#allocation2 + $0x1b0] sm:$0xff] }
  0x21   :  { %791 = vmatprep.subr.bf16.mxu0 %v790_v30  ;;  %v58_v9 = vld [vmem:[#allocation2 + $0xe8] sm:$0xff]  ;;  %815 = vmatprep.subr.bf16.mxu1 %v814_v58  ;;  %v820_v13 = vpack.c.bf16 %v66_v6, %v65_v5  ;;  %v84_v15 = vld [vmem:[#allocation2 + $0x1b8] sm:$0xff]  ;;  %v800_v16 = vpack.c.bf16 %v40_v63, %v39_v62  ;;  %v67_v18 = vld [vmem:[#allocation2 + $0x130] sm:$0xff] }
  0x22   :  { %237 = vmatprep.mubr.f32.mxu0 %v157_v57  ;;  %v158_v7 = vcombine.high %v1031_v60, %v1031_v60  ;;  %v822_v17 = vpack.c.bf16 %v84_v15, %v83_v14  ;;  %v68_v19 = vld [vmem:[#allocation2 + $0x138] sm:$0xff]  ;;  %v802_v20 = vpack.c.bf16 %v58_v9, %v57_v8  ;;  %v41_v21 = vld [vmem:[#allocation2 + $0x60] sm:$0xff]  ;;  %v42_v22 = vld [vmem:[#allocation2 + $0x68] sm:$0xff] }
  0x23   :  { %908 = vset.pattern.permute.xlu1 %v974_v56  ;;  %910 = vset.pattern.permute.xlu0 %v975_v12  ;;  %v59_v23 = vld [vmem:[#allocation2 + $0xf0] sm:$0xff]  ;;  %v60_v24 = vld [vmem:[#allocation2 + $0xf8] sm:$0xff]  ;;  %v85_v25 = vld [vmem:[#allocation2 + $0x1c0] sm:$0xff]  ;;  %v824_v27 = vpack.c.bf16 %v68_v19, %v67_v18  ;;  %v804_v28 = vpack.c.bf16 %v42_v22, %v41_v21 }
  0x24   :  { %436 = vperm.xlu1 %908, %v1015_v2   ;;  %793 = vmatpush3.bf16.msra.mxu0 %v792_v41  ;;  %v86_v26 = vld [vmem:[#allocation2 + $0x1c8] sm:$0xff]  ;;  %v43_v29 = vld [vmem:[#allocation2 + $0x70] sm:$0xff]  ;;  %v69_v31 = vld [vmem:[#allocation2 + $0x140] sm:$0xff] }
  0x25   :  { %795 = vmatprep.subr.bf16.mxu0 %v794_v46  ;;  %817 = vmatpush3.bf16.msra.mxu1 %v816_v0  ;;  %v826_v30 = vpack.c.bf16 %v86_v26, %v85_v25  ;;  %v70_v32 = vld [vmem:[#allocation2 + $0x148] sm:$0xff]  ;;  %v44_v33 = vld [vmem:[#allocation2 + $0x78] sm:$0xff]  ;;  %v87_v34 = vld [vmem:[#allocation2 + $0x1d0] sm:$0xff] }
  0x26   :  { %307 = vmatprep.mubr.f32.mxu1 %v158_v7  ;;  %819 = vmatprep.subr.bf16.mxu1 %v818_v10  ;;  %v88_v35 = vld [vmem:[#allocation2 + $0x1d8] sm:$0xff]  ;;  %v109_v36 = vld [vmem:[#allocation2 + $0x280] sm:$0xff]  ;;  %v110_v37 = vld [vmem:[#allocation2 + $0x288] sm:$0xff]  ;;  %v828_v38 = vpack.c.bf16 %v70_v32, %v69_v31  ;;  %v808_v39 = vpack.c.bf16 %v44_v33, %v43_v29 }
  0x27   :  { %v93_v40 = vld [vmem:[#allocation2 + $0x200] sm:$0xff]  ;;  %v830_v41 = vpack.c.bf16 %v88_v35, %v87_v34  ;;  %v71_v42 = vld [vmem:[#allocation2 + $0x150] sm:$0xff]  ;;  %v72_v43 = vld [vmem:[#allocation2 + $0x158] sm:$0xff]  ;;  %v842_v44 = vpack.c.bf16 %v110_v37, %v109_v36 }
  0x28   :  { %909 = vset.pattern.permute.xlu1 %v975_v12  ;;  %797 = vmatpush3.bf16.msra.mxu0 %v796_v61  ;;  %v94_v45 = vld [vmem:[#allocation2 + $0x208] sm:$0xff]  ;;  %v89_v46 = vld [vmem:[#allocation2 + $0x1e0] sm:$0xff]  ;;  %v111_v48 = vld [vmem:[#allocation2 + $0x290] sm:$0xff]  ;;  %v832_v52 = vpack.c.bf16 %v72_v43, %v71_v42 }
  0x29   :  { %443 = vperm.xlu1 %909, %v1015_v2   ;;  %799 = vmatprep.subr.bf16.mxu0 %v798_v3  ;;  %v806_v2 = vpack.c.bf16 %v60_v24, %v59_v23  ;;  %v90_v47 = vld [vmem:[#allocation2 + $0x1e8] sm:$0xff]  ;;  %v112_v49 = vld [vmem:[#allocation2 + $0x298] sm:$0xff]  ;;  %v95_v50 = vld [vmem:[#allocation2 + $0x210] sm:$0xff]  ;;  %v844_v53 = vpack.c.bf16 %v94_v45, %v93_v40  ;;  %v976_v24 = vmov 0.0|0.0  }
  0x2a   :  { %821 = vmatpush3.bf16.msra.mxu1 %v820_v13  ;;  %v834_v54 = vpack.c.bf16 %v90_v47, %v89_v46  ;;  %v73_v55 = vld [vmem:[#allocation2 + $0x160] sm:$0xff]  ;;  %v74_v56 = vld [vmem:[#allocation2 + $0x168] sm:$0xff]  ;;  %v846_v58 = vpack.c.bf16 %v112_v49, %v111_v48  ;;  %v96_v59 = vld [vmem:[#allocation2 + $0x218] sm:$0xff] }
  0x2b   :  { %823 = vmatprep.subr.bf16.mxu1 %v822_v17  ;;  %v1040_v57 = vld.sshfl [vmem:[%s1073_s0 + $0x8] sm:$0x33 pattern:$0x76325410]  ;;  %v91_v61 = vld [vmem:[#allocation2 + $0x1f0] sm:$0xff]  ;;  %v92_v62 = vld [vmem:[#allocation2 + $0x1f8] sm:$0xff]  ;;  %v836_v3 = vpack.c.bf16 %v74_v56, %v73_v55  ;;  %v848_v4 = vpack.c.bf16 %v96_v59, %v95_v50 }
  0x2c   :  { %801 = vmatpush3.bf16.msra.mxu0 %v800_v16  ;;  %v166_v63 = vcombine.high %v1040_v57, %v1040_v57  ;;  %v113_v0 = vld [vmem:[#allocation2 + $0x2a0] sm:$0xff]  ;;  %v114_v1 = vld [vmem:[#allocation2 + $0x2a8] sm:$0xff]  ;;  %v838_v5 = vpack.c.bf16 %v92_v62, %v91_v61  ;;  %v75_v6 = vld [vmem:[#allocation2 + $0x170] sm:$0xff]  ;;  %v393_v59 = vand.u32 127, %v146_v11  ;;  %s979_s0 = smov [#allocation5]  }
  0x2d   :  { %803 = vmatprep.subr.bf16.mxu0 %v802_v20  ;;  %v76_v7 = vld [vmem:[#allocation2 + $0x178] sm:$0xff]  ;;  %v850_v8 = vpack.c.bf16 %v114_v1, %v113_v0  ;;  %v97_v9 = vld [vmem:[#allocation2 + $0x220] sm:$0xff]  ;;  %v98_v10 = vld [vmem:[#allocation2 + $0x228] sm:$0xff]  ;;  %s616_s30 = sshll.u32 %s979_s0, 4  ;;  %s617_s30 = int_to_ptr.vmem [resolvable:$true] %s616_s30 }
  0x2e   :  { %825 = vmatpush3.bf16.msra.mxu1 %v824_v27  ;;  %v115_v12 = vld [vmem:[#allocation2 + $0x2b0] sm:$0xff]  ;;  %v116_v13 = vld [vmem:[#allocation2 + $0x2b8] sm:$0xff]  ;;  %v840_v14 = vpack.c.bf16 %v76_v7, %v75_v6  ;;  %v852_v15 = vpack.c.bf16 %v98_v10, %v97_v9  ;;  %v126_v16 = vld [vmem:[#allocation2 + $0x308] sm:$0xff]  ;;  %s938_s4 = scalar_lea.vmem %s617_s30, 32  ;;  %p943_p9 = scmp.lt.s32.totalorder %s617_s30, %s617_s30 }
  0x2f   :  { %827 = vmatprep.subr.bf16.mxu1 %v826_v30  ;;  %v854_v17 = vpack.c.bf16 %v116_v13, %v115_v12  ;;  %v99_v18 = vld [vmem:[#allocation2 + $0x230] sm:$0xff]  ;;  %v100_v19 = vld [vmem:[#allocation2 + $0x238] sm:$0xff]  ;;  %v117_v20 = vld [vmem:[#allocation2 + $0x2c0] sm:$0xff]  ;;  %p939_p8 = scmp.ne.s32.totalorder %s617_s30, %s938_s4  ;;  %p944_p10 = scmp.lt.s32.totalorder %s938_s4, %s938_s4 }
  0x30   :  { %805 = vmatpush3.bf16.msra.mxu0 %v804_v28  ;;  %v118_v21 = vld [vmem:[#allocation2 + $0x2c8] sm:$0xff]  ;;  %v856_v23 = vpack.c.bf16 %v100_v19, %v99_v18  ;;  %v127_v25 = vld [vmem:[#allocation2 + $0x310] sm:$0xff]  ;;  %v128_v26 = vld [vmem:[#allocation2 + $0x318] sm:$0xff] }
  0x31   :  { %807 = vmatprep.subr.bf16.mxu0 %v806_v2  ;;  %v858_v27 = vpack.c.bf16 %v118_v21, %v117_v20  ;;  %v101_v28 = vld [vmem:[#allocation2 + $0x240] sm:$0xff]  ;;  %v102_v29 = vld [vmem:[#allocation2 + $0x248] sm:$0xff]  ;;  %v119_v30 = vld [vmem:[#allocation2 + $0x2d0] sm:$0xff]  ;;  %v878_v32 = vpack.c.bf16 %v128_v26, %v127_v25  ;;  %v978_v2 = vmov 0.0   ;;  %p945_p11 = por %p944_p10, %p943_p9 }
  0x32   :  { %829 = vmatpush3.bf16.msra.mxu1 %v828_v38  ;;  %v120_v31 = vld [vmem:[#allocation2 + $0x2d8] sm:$0xff]  ;;  %v860_v33 = vpack.c.bf16 %v102_v29, %v101_v28  ;;  %v129_v34 = vld [vmem:[#allocation2 + $0x320] sm:$0xff]  ;;  %v130_v35 = vld [vmem:[#allocation2 + $0x328] sm:$0xff] }
  0x33   :  { %831 = vmatprep.subr.bf16.mxu1 %v830_v41  ;;  %v862_v36 = vpack.c.bf16 %v120_v31, %v119_v30  ;;  %v103_v37 = vld [vmem:[#allocation2 + $0x250] sm:$0xff]  ;;  %v104_v38 = vld [vmem:[#allocation2 + $0x258] sm:$0xff]  ;;  %v122_v40 = vld [vmem:[#allocation2 + $0x2e8] sm:$0xff]  ;;  %p946_p12 = pnand %p945_p11, %p939_p8 }
  0x34   :  { %809 = vmatpush3.bf16.msra.mxu0 %v808_v39  ;;  %v121_v39 = vld [vmem:[#allocation2 + $0x2e0] sm:$0xff]  ;;  %v864_v41 = vpack.c.bf16 %v104_v38, %v103_v37  ;;  %v131_v42 = vld [vmem:[#allocation2 + $0x330] sm:$0xff]  ;;  %v132_v43 = vld [vmem:[#allocation2 + $0x338] sm:$0xff] }
  0x35   :  { %843 = vmatprep.subr.bf16.mxu0 %v842_v44  ;;  %v866_v44 = vpack.c.bf16 %v122_v40, %v121_v39  ;;  %v105_v45 = vld [vmem:[#allocation2 + $0x260] sm:$0xff]  ;;  %v106_v46 = vld [vmem:[#allocation2 + $0x268] sm:$0xff]  ;;  %v123_v47 = vld [vmem:[#allocation2 + $0x2f0] sm:$0xff]  ;;  %v884_v49 = vpack.c.bf16 %v132_v43, %v131_v42 }
  0x36   :  { %833 = vmatpush3.bf16.msra.mxu1 %v832_v52  ;;  %v124_v48 = vld [vmem:[#allocation2 + $0x2f8] sm:$0xff]  ;;  %v868_v50 = vpack.c.bf16 %v106_v46, %v105_v45  ;;  %v625_v20 = vld [vmem:[#allocation2 + $0x340] ss:$0 sm:$0xff] }
  0x37   :  { %238 = vmatmul.mubr.f32.vlgmr.msra.gmra.mrb[0].mxu0 %v1027_v51  ;;  %835 = vmatprep.subr.bf16.mxu1 %v834_v54  ;;  %v125_v51 = vld [vmem:[#allocation2 + $0x300] sm:$0xff]  ;;  %v870_v52 = vpack.c.bf16 %v124_v48, %v123_v47  ;;  %v108_v54 = vld [vmem:[#allocation2 + $0x278] sm:$0xff] }
  0x38   :  { %845 = vmatpush3.bf16.msra.mxu0 %v844_v53  ;;  %377 = vmatprep.mubr.f32.mxu0 %v166_v63  ;;  %v875_v22 = vpack.c.bf16 %v126_v16, %v125_v51  ;;  %v107_v53 = vld [vmem:[#allocation2 + $0x270] sm:$0xff] }
  0x39   :  { %847 = vmatprep.subr.bf16.mxu0 %v846_v58  ;;  %v872_v55 = vpack.c.bf16 %v108_v54, %v107_v53 }
  0x3a   :  { %837 = vmatpush3.bf16.msra.mxu1 %v836_v3 }
  0x3b   :  { %839 = vmatprep.subr.bf16.mxu1 %v838_v5 }
  0x3c   :  { %849 = vmatpush3.bf16.msra.mxu0 %v848_v4 }
  0x3d   :  { %851 = vmatprep.subr.bf16.mxu0 %v850_v8 }
  0x3e   :  { %841 = vmatpush3.bf16.msra.mxu1 %v840_v14 }
  0x3f   :  { %874 = vmatprep.subr.bf16.mxu1 %v976_v24 }
  0x40   :  { %853 = vmatpush3.bf16.msra.mxu0 %v852_v15 }
  0x41   :  { %855 = vmatprep.subr.bf16.mxu0 %v854_v17  ;;  %308 = vmatmul.mubr.f32.vlgmr.msra.gmra.mrb[0].mxu1 %v1031_v60  ;;  %v881_v60 = vpack.c.bf16 %v130_v35, %v129_v34 }
  0x42   :  { %876 = vmatpush3.bf16.msra.mxu1 %v875_v22  ;;  %770 = vmatprep.mubr.msk.f32.mxu1 %vm977_vm0, %v978_v2 }
  0x43   :  { %877 = vmatprep.subr.bf16.mxu1 %v976_v24 }
  0x44   :  { %857 = vmatpush3.bf16.msra.mxu0 %v856_v23 }
  0x45   :  { %859 = vmatprep.subr.bf16.mxu0 %v858_v27 }
  0x46   :  { %879 = vmatpush3.bf16.msra.mxu1 %v878_v32 }
  0x47   :  { %880 = vmatprep.subr.bf16.mxu1 %v976_v24 }
  0x48   :  { %861 = vmatpush3.bf16.msra.mxu0 %v860_v33 }
  0x49   :  { %863 = vmatprep.subr.bf16.mxu0 %v862_v36 }
  0x4a   :  { %882 = vmatpush3.bf16.msra.mxu1 %v881_v60 }
  0x4b   :  { %883 = vmatprep.subr.bf16.mxu1 %v976_v24 }
  0x4c   :  { %865 = vmatpush3.bf16.msra.mxu0 %v864_v41 }
  0x4d   :  { %867 = vmatprep.subr.bf16.mxu0 %v866_v44 }
  0x4e   :  { %885 = vmatpush3.bf16.msra.mxu1 %v884_v49 }
  0x4f   :  { %773 = vmatprep.subr.mxu1 %v978_v2 }
  0x50   :  { %869 = vmatpush3.bf16.msra.mxu0 %v868_v50 }
  0x51   :  { %871 = vmatprep.subr.bf16.mxu0 %v870_v52 }
  0x54   :  { %873 = vmatpush3.bf16.msra.mxu0 %v872_v55 }
  0x57   :  { %378 = vmatmul.mubr.f32.vlgmr.msra.gmra.mrb[2].mxu0 %v1040_v57 }
  0x94   :  { %v409_v56 = vpop.permute.xlu1 %408  ;;  %v396_v58 = vpop.permute.xlu0 %395 }
  0x95   :  { %vm397_vm1 = vcmp.eq.s32.totalorder %v396_v58, %v393_v59  ;;  %vm410_vm2 = vcmp.eq.s32.totalorder %v409_v56, %v393_v59 }
  0x96   :  { %v627_v63 = vsel %vm397_vm1, 1.0, %v978_v2  ;;  %v629_v3 = vsel %vm410_vm2, 1.0, %v978_v2 }
  0x99   :  { %v416_v61 = vpop.permute.xlu1 %415  ;;  %v402_v62 = vpop.permute.xlu0 %401 }
  0x9a   :  { %vm403_vm3 = vcmp.eq.s32.totalorder %v402_v62, %v393_v59  ;;  %vm417_vm4 = vcmp.eq.s32.totalorder %v416_v61, %v393_v59 }
  0x9b   :  { %v628_v0 = vsel %vm403_vm3, 1.0, %v978_v2  ;;  %v630_v6 = vsel %vm417_vm4, 1.0, %v978_v2 }
  0x9c   :  { %v406_v1 = vadd.f32 %v628_v0, %v627_v63 }
  0x9e   :  { %v413_v4 = vadd.f32 %v629_v3, %v406_v1  ;;  %v423_v5 = vpop.permute.xlu1 %422  ;;  %v430_v57 = vpop.permute.xlu0 %429 }
  0x9f   :  { %vm424_vm5 = vcmp.eq.s32.totalorder %v423_v5, %v393_v59  ;;  %vm431_vm6 = vcmp.eq.s32.totalorder %v430_v57, %v393_v59 }
  0xa0   :  { %v420_v11 = vadd.f32 %v630_v6, %v413_v4  ;;  %v631_v7 = vsel %vm424_vm5, 1.0, %v978_v2  ;;  %v632_v9 = vsel %vm431_vm6, 1.0, %v978_v2 }
  0xa2   :  { %v427_v8 = vadd.f32 %v631_v7, %v420_v11 }
  0xa3   :  { %v437_v10 = vpop.permute.xlu1 %436 }
  0xa4   :  { %vm438_vm7 = vcmp.eq.s32.totalorder %v437_v10, %v393_v59  ;;  %v434_v12 = vadd.f32 %v632_v9, %v427_v8 }
  0xa5   :  { %v633_v13 = vsel %vm438_vm7, 1.0, %v978_v2 }
  0xa6   :  { %v441_v15 = vadd.f32 %v633_v13, %v434_v12 }
  0xa8   :  { %v444_v14 = vpop.permute.xlu1 %443 }
  0xa9   :  { %vm445_vm8 = vcmp.eq.s32.totalorder %v444_v14, %v393_v59 }
  0xaa   :  { %v634_v51 = vsel %vm445_vm8, 1.0, %v978_v2 }
  0xab   :  { %v448_v16 = vadd.f32 %v634_v51, %v441_v15 }
  0xad   :  { %771 = vmatmul.mubr.msk.f32.vlgmr.msra.gmra.mrb[2].mxu1 %vm449_vm9, %v448_v16 }
  0xae   :  { %775 = vmatprep.mubr.msk.f32.mxu1 %vm977_vm0, %v978_v2 }
 0x10a   :  { %v670_v17 = vpop.f32.mrb[0].mxu0 }
 0x10b   :  { %v671_v18 = vpop.f32.mrb[1].mxu0 }
 0x10c   :  { %v672_v19 = vadd.f32 %v671_v18, %v670_v17 }
 0x10e   :  { %v240_v21 = vadd.f32 %v672_v19, %v625_v20 }
 0x114   :  { %v705_v22 = vpop.f32.mrb[0].mxu1 }
 0x115   :  { %v706_v23 = vpop.f32.mrb[1].mxu1 }
 0x116   :  { %v707_v24 = vadd.f32 %v706_v23, %v705_v22 }
 0x118   :  { %v310_v25 = vadd.f32 %v707_v24, %v240_v21 }
 0x12a   :  { %v740_v26 = vpop.f32.mrb[2].mxu0 }
 0x12b   :  { %v741_v27 = vpop.f32.mrb[3].mxu0 }
 0x12c   :  { %v742_v28 = vadd.f32 %v741_v27, %v740_v26 }
 0x12e   :  { %v380_v29 = vadd.f32 %v742_v28, %v310_v25 }
 0x130   :  { %v383_v30 = vmul.f32 %v380_v29, %v380_v29 }
 0x132   :  { %v385_v31 = vsel %vm384_vm10, %v383_v30, 0.0 }
 0x133   :  { %386 = vadd.xlane.f32.xlu1 %v385_v31 }
 0x180   :  { %v519_v32 = vpop.f32.mrb[2].mxu1 }
 0x181   :  { %v523_v33 = vmul.f32 %v519_v32, %v519_v32  ;;  %v772_v2 = vpop.f32.mrb[3].mxu1 }
 0x183   :  { %v524_v34 = vsel %vm384_vm10, %v523_v33, 0.0 }
 0x184   :  { %525 = vadd.xlane.f32.xlu0 %v524_v34 }
 0x1c0   :  { %v387_v35 = vpop.xlane.xlu1 %386 }
 0x1c1   :  { %v388_v36 = vadd.f32 1e-12, %v387_v35 }
 0x211   :  { %v526_v37 = vpop.xlane.xlu0 %525 }
 0x212   :  { %v527_v38 = vadd.f32 1e-12, %v526_v37 }
 0x214   :  { %912 = vrsqrt.f32 %v527_v38 }
 0x215   :  { %914 = vrsqrt.f32 %v388_v36 }
 0x21e   :  { %v913_v39 = vpop.eup %912 }
 0x21f   :  { %v915_v40 = vpop.eup %914  ;;  %v529_v60 = vmul.f32 %v913_v39, %v519_v32 }
 0x220   :  { %v390_v41 = vmul.f32 %v915_v40, %v380_v29 }
 0x221   :  { %774 = vmatpush3.xpose.msk.msra.mxu1 %vm530_vm11, %v529_v60 }
 0x224   :  { %776 = vmatmul.mubr.msk.f32.vlgmr.msra.gmra.mrb[4].mxu1 %vm530_vm11, %v390_v41 }
 0x2f7   :  { %v603_v42 = vpop.f32.mrb[4].mxu1 }
 0x2f8   :  { %v607_v43 = vsub.f32 1.0, %v603_v42  ;;  %v777_v44 = vpop.f32.mrb[5].mxu1 }
 0x2fa   :  { %609 = vst.msk [vmem:[#allocation5] sm:$0x3] %vm608_vm12, %v607_v43 }
 0x2fb   :  { %949 = shalt.err (!%p946_p12)
}
 0x2fc   :  { %s950_s7 = scalar_lea.hbm %s1076_s3, 32 }
 0x2fd   :  { %p951_p13 = scmp.ne.s32.totalorder %s1076_s3, %s950_s7  ;;  %p954_p0 = scmp.lt.u32.totalorder %s950_s7, %s1076_s3 }
 0x2ff   :  { %p956_p1 = pnand %p954_p0, %p951_p13 }
 0x301   :  { %959 = shalt.err (!%p956_p1)
}
 0x302   :  { %619 = dma.vmem_to_hbm [thread:$0]  %s617_s30, 32, %s1076_s3, [#allocation4]  }
 0x303   :  { %962 = dma.done.wait [#allocation4], 32  }
 0x304   :  { %963 = vsyncadd [#allocation4], 4294967264 }
 0x305   :  { %623 = vsyncpa [#allocation3], 1 }
 0x306   :  { %624 = vsyncpa [#allocation4], 1 }

</bundles_post_ra>
